<compile_context>
chip_gen: v5e
topology: v5e:2x2
jax: 0.10.0
libtpu: 0.0.40
codegen_flags: <defaults>
</compile_context>

<pallas_src>
import jax
import jax.numpy as jnp
from jax import lax
from jax.experimental import pallas as pl
from jax.experimental.pallas import tpu as pltpu
import numpy as np


def lstm2_kernel(embeds_ref, wih_ref, b_ref, whh_f_ref, wfc_ref, bfc_ref, out_ref):
    L, _ = embeds_ref.shape
    H = whh_f_ref.shape[0]
    G = 4 * H

    # ---- hoisted, fused input projection: (L, E) @ (E, 8H) + (1, 8H) -------
    xproj = (jnp.dot(embeds_ref[...], wih_ref[...],
                     preferred_element_type=jnp.float32)
             + b_ref[...])                                   # (L, 8H)

    def lstm_gates(pre):
        # pre: (1, 4H) pre-activation gates. One sigmoid over the full vreg,
        # tanh only on the g slice -> 2 EUP transcendentals instead of 4.
        sg = jax.nn.sigmoid(pre)
        i = sg[:, 0:H]
        f = sg[:, H:2 * H]
        o = sg[:, 3 * H:4 * H]
        g = jnp.tanh(pre[:, 2 * H:3 * H])
        return i, f, g, o

    # ---- forward direction: fully static unroll, (h, c) live in vregs ------
    # TODO(synk): jnp.dot keeps Whh re-loaded into the MXU each step; for long
    # sequences consider pltpu.matmul_push_rhs/acc_lhs/pop to pin Whh.
    h = jnp.zeros((1, H), jnp.float32)
    c = jnp.zeros((1, H), jnp.float32)
    whh_f = whh_f_ref[...]
    for t in range(L):  # L is static at trace time; only h @ Whh is serial.
        pre = xproj[t:t + 1, 0:G] + jnp.dot(h, whh_f,
                                            preferred_element_type=jnp.float32)
        i, f, g, o = lstm_gates(pre)
        c = f * c + i * g
        h = o * jnp.tanh(c)
    h_fwd_last = h                                           # output[-1, :H]

    # ---- backward direction: first step of the reverse scan (t = L-1) ------
    # Zero initial state => h @ Whh_bwd == 0 and f * c == 0.
    pre_b = xproj[L - 1:L, G:2 * G]
    i_b, _, g_b, o_b = lstm_gates(pre_b)
    h_bwd_last = o_b * jnp.tanh(i_b * g_b)                   # output[-1, H:]

    # ---- fc + log_softmax: single (1, 2H) @ (2H, C) matmul ------------------
    h_cat = jnp.concatenate([h_fwd_last, h_bwd_last], axis=1)  # (1, 2H)
    tag = (jnp.dot(h_cat, wfc_ref[...], preferred_element_type=jnp.float32)
           + bfc_ref[...])                                     # (1, C)
    m = jnp.max(tag, axis=1, keepdims=True)
    z = tag - m
    lse = jnp.log(jnp.sum(jnp.exp(z), axis=1, keepdims=True))
    out_ref[...] = z - lse


def lstm2_forward(x_idx, params):
    """x_idx: (L,) int32 token indices.  Returns (C,) log-softmax scores."""
    # TODO(synk): for long L / large E, stream `embeds` via a grid axis +
    # BlockSpec (or move the gather in-kernel with scalar-prefetched indices)
    # instead of a whole-array VMEM in_spec.
    embeds = params["emb"][x_idx]                        # embedding gather (glue)
    C = params["wfc"].shape[1]

    # Fuse forward/backward input-projection weights: one (E, 8H) matmul
    # operand and one (1, 8H) bias.
    wih_fused = jnp.concatenate([params["wih_f"], params["wih_b"]], axis=1)
    b_fused = jnp.concatenate([params["b_f"], params["b_b"]], axis=1)

    out = pl.pallas_call(
        lstm2_kernel,
        out_shape=jax.ShapeDtypeStruct((1, C), jnp.float32),
        in_specs=[pl.BlockSpec(memory_space=pltpu.MemorySpace.VMEM)] * 6,
        out_specs=pl.BlockSpec(memory_space=pltpu.MemorySpace.VMEM),
    )(embeds, wih_fused, b_fused, params["whh_f"], params["wfc"], params["bfc"])
    return out[0]


def init_params(key, alph_dim, embedding_dim, hidden_dim, num_classes):
    ks = jax.random.split(key, 10)
    k = 1.0 / np.sqrt(hidden_dim)
    u = lambda kk, shape: jax.random.uniform(kk, shape, jnp.float32, -k, k)
    return {
        "emb":   jax.random.normal(ks[0], (alph_dim, embedding_dim), jnp.float32),
        # forward direction (transposed, gate order i,f,g,o; b = b_ih + b_hh)
        "wih_f": u(ks[1], (embedding_dim, 4 * hidden_dim)),
        "whh_f": u(ks[2], (hidden_dim, 4 * hidden_dim)),
        "b_f":   u(ks[3], (1, 4 * hidden_dim)),
        # backward direction
        "wih_b": u(ks[4], (embedding_dim, 4 * hidden_dim)),
        "whh_b": u(ks[5], (hidden_dim, 4 * hidden_dim)),
        "b_b":   u(ks[6], (1, 4 * hidden_dim)),
        # fc: (2H, C) + (1, C)
        "wfc":   u(ks[7], (2 * hidden_dim, num_classes)),
        "bfc":   u(ks[8], (1, num_classes)),
    }


def lstm2_reference(x_idx, p):
    """Pure-JAX reference mirroring torch.nn.LSTM(bidirectional=True) semantics."""
    embeds = p["emb"][x_idx]
    H = p["whh_f"].shape[0]

    def cell(carry, x_t, wih, whh, b):
        h, c = carry
        gates = x_t @ wih + h @ whh + b
        i = jax.nn.sigmoid(gates[0:H])
        f = jax.nn.sigmoid(gates[H:2 * H])
        g = jnp.tanh(gates[2 * H:3 * H])
        o = jax.nn.sigmoid(gates[3 * H:4 * H])
        c = f * c + i * g
        h = o * jnp.tanh(c)
        return (h, c), h

    init = (jnp.zeros(H, jnp.float32), jnp.zeros(H, jnp.float32))
    _, hs_f = lax.scan(lambda c, x: cell(c, x, p["wih_f"], p["whh_f"], p["b_f"][0]),
                       init, embeds)
    _, hs_b = lax.scan(lambda c, x: cell(c, x, p["wih_b"], p["whh_b"], p["b_b"][0]),
                       init, embeds[::-1])
    hs_b = hs_b[::-1]
    last = jnp.concatenate([hs_f[-1], hs_b[-1]])         # output[-1]
    tag = last @ p["wfc"] + p["bfc"][0]
    return jax.nn.log_softmax(tag, axis=0)


if __name__ == "__main__":
    ALPH, EMB, HID, NCLS, SEQ = 20, 32, 32, 8, 8

    key = jax.random.PRNGKey(0)
    kp, kx = jax.random.split(key)
    params = init_params(kp, ALPH, EMB, HID, NCLS)
    x_idx = jax.random.randint(kx, (SEQ,), 0, ALPH, dtype=jnp.int32)

    scores = jax.block_until_ready(lstm2_forward(x_idx, params))
    ref = jax.block_until_ready(lstm2_reference(x_idx, params))

    assert scores.shape == (NCLS,)
    np.testing.assert_allclose(np.asarray(scores), np.asarray(ref),
                               rtol=1e-5, atol=1e-5)
    print("KERNEL_OK")
</pallas_src>

<mosaic_0001>
module attributes {stable_mosaic.version = 11 : i64} {
  func.func @lstm2_kernel(%arg0: memref<8x32xf32, #tpu.memory_space<vmem>>, %arg1: memref<32x256xf32, #tpu.memory_space<vmem>>, %arg2: memref<1x256xf32, #tpu.memory_space<vmem>>, %arg3: memref<32x128xf32, #tpu.memory_space<vmem>>, %arg4: memref<64x8xf32, #tpu.memory_space<vmem>>, %arg5: memref<1x8xf32, #tpu.memory_space<vmem>>, %arg6: memref<1x8xf32, #tpu.memory_space<vmem>>) attributes {dimension_semantics = [], scalar_prefetch = 0 : i64, scratch_operands = 0 : i64, tpu.core_type = #tpu.core_type<tc>} {
    %c0 = arith.constant 0 : index
    %c0_0 = arith.constant 0 : index
    %0 = vector.load %arg0[%c0, %c0_0] : memref<8x32xf32, #tpu.memory_space<vmem>>, vector<8x32xf32>
    %c0_1 = arith.constant 0 : index
    %c0_2 = arith.constant 0 : index
    %1 = vector.load %arg1[%c0_1, %c0_2] : memref<32x256xf32, #tpu.memory_space<vmem>>, vector<32x256xf32>
    %cst = arith.constant dense<0.000000e+00> : vector<8x256xf32>
    %2 = tpu.matmul %0, %1, %cst {dimension_numbers = #tpu.dot_dimension_numbers<[1], [0], [0], [1], [0, 0, 1, 1], [], []>} : vector<8x32xf32>, vector<32x256xf32>, vector<8x256xf32> -> vector<8x256xf32>
    %c0_3 = arith.constant 0 : index
    %c0_4 = arith.constant 0 : index
    %3 = vector.load %arg2[%c0_3, %c0_4] : memref<1x256xf32, #tpu.memory_space<vmem>>, vector<1x256xf32>
    %4 = vector.broadcast %3 : vector<1x256xf32> to vector<8x256xf32>
    %5 = arith.addf %2, %4 : vector<8x256xf32>
    %cst_5 = arith.constant 0.000000e+00 : f32
    %6 = vector.broadcast %cst_5 : f32 to vector<1x32xf32>
    %cst_6 = arith.constant 0.000000e+00 : f32
    %7 = vector.broadcast %cst_6 : f32 to vector<1x32xf32>
    %c0_7 = arith.constant 0 : index
    %c0_8 = arith.constant 0 : index
    %8 = vector.load %arg3[%c0_7, %c0_8] : memref<32x128xf32, #tpu.memory_space<vmem>>, vector<32x128xf32>
    %9 = vector.extract_strided_slice %5 {offsets = [0, 0], sizes = [1, 128], strides = [1, 1]} : vector<8x256xf32> to vector<1x128xf32>
    %cst_9 = arith.constant dense<0.000000e+00> : vector<1x128xf32>
    %10 = tpu.matmul %6, %8, %cst_9 {dimension_numbers = #tpu.dot_dimension_numbers<[1], [0], [0], [1], [0, 0, 1, 1], [], []>} : vector<1x32xf32>, vector<32x128xf32>, vector<1x128xf32> -> vector<1x128xf32>
    %11 = arith.addf %9, %10 : vector<1x128xf32>
    %12 = arith.negf %11 : vector<1x128xf32>
    %13 = math.exp %12 : vector<1x128xf32>
    %cst_10 = arith.constant 1.000000e+00 : f32
    %14 = vector.broadcast %cst_10 : f32 to vector<1x128xf32>
    %15 = arith.addf %14, %13 : vector<1x128xf32>
    %16 = arith.divf %14, %15 : vector<1x128xf32>
    %17 = vector.extract_strided_slice %16 {offsets = [0, 0], sizes = [1, 32], strides = [1, 1]} : vector<1x128xf32> to vector<1x32xf32>
    %18 = vector.extract_strided_slice %16 {offsets = [0, 32], sizes = [1, 32], strides = [1, 1]} : vector<1x128xf32> to vector<1x32xf32>
    %19 = vector.extract_strided_slice %16 {offsets = [0, 96], sizes = [1, 32], strides = [1, 1]} : vector<1x128xf32> to vector<1x32xf32>
    %20 = vector.extract_strided_slice %11 {offsets = [0, 64], sizes = [1, 32], strides = [1, 1]} : vector<1x128xf32> to vector<1x32xf32>
    %21 = math.tanh %20 : vector<1x32xf32>
    %22 = arith.mulf %18, %7 : vector<1x32xf32>
    %23 = arith.mulf %17, %21 : vector<1x32xf32>
    %24 = arith.addf %22, %23 : vector<1x32xf32>
    %25 = math.tanh %24 : vector<1x32xf32>
    %26 = arith.mulf %19, %25 : vector<1x32xf32>
    %27 = vector.extract_strided_slice %5 {offsets = [1, 0], sizes = [1, 128], strides = [1, 1]} : vector<8x256xf32> to vector<1x128xf32>
    %cst_11 = arith.constant dense<0.000000e+00> : vector<1x128xf32>
    %28 = tpu.matmul %26, %8, %cst_11 {dimension_numbers = #tpu.dot_dimension_numbers<[1], [0], [0], [1], [0, 0, 1, 1], [], []>} : vector<1x32xf32>, vector<32x128xf32>, vector<1x128xf32> -> vector<1x128xf32>
    %29 = arith.addf %27, %28 : vector<1x128xf32>
    %30 = arith.negf %29 : vector<1x128xf32>
    %31 = math.exp %30 : vector<1x128xf32>
    %cst_12 = arith.constant 1.000000e+00 : f32
    %32 = vector.broadcast %cst_12 : f32 to vector<1x128xf32>
    %33 = arith.addf %32, %31 : vector<1x128xf32>
    %34 = arith.divf %32, %33 : vector<1x128xf32>
    %35 = vector.extract_strided_slice %34 {offsets = [0, 0], sizes = [1, 32], strides = [1, 1]} : vector<1x128xf32> to vector<1x32xf32>
    %36 = vector.extract_strided_slice %34 {offsets = [0, 32], sizes = [1, 32], strides = [1, 1]} : vector<1x128xf32> to vector<1x32xf32>
    %37 = vector.extract_strided_slice %34 {offsets = [0, 96], sizes = [1, 32], strides = [1, 1]} : vector<1x128xf32> to vector<1x32xf32>
    %38 = vector.extract_strided_slice %29 {offsets = [0, 64], sizes = [1, 32], strides = [1, 1]} : vector<1x128xf32> to vector<1x32xf32>
    %39 = math.tanh %38 : vector<1x32xf32>
    %40 = arith.mulf %36, %24 : vector<1x32xf32>
    %41 = arith.mulf %35, %39 : vector<1x32xf32>
    %42 = arith.addf %40, %41 : vector<1x32xf32>
    %43 = math.tanh %42 : vector<1x32xf32>
    %44 = arith.mulf %37, %43 : vector<1x32xf32>
    %45 = vector.extract_strided_slice %5 {offsets = [2, 0], sizes = [1, 128], strides = [1, 1]} : vector<8x256xf32> to vector<1x128xf32>
    %cst_13 = arith.constant dense<0.000000e+00> : vector<1x128xf32>
    %46 = tpu.matmul %44, %8, %cst_13 {dimension_numbers = #tpu.dot_dimension_numbers<[1], [0], [0], [1], [0, 0, 1, 1], [], []>} : vector<1x32xf32>, vector<32x128xf32>, vector<1x128xf32> -> vector<1x128xf32>
    %47 = arith.addf %45, %46 : vector<1x128xf32>
    %48 = arith.negf %47 : vector<1x128xf32>
    %49 = math.exp %48 : vector<1x128xf32>
    %cst_14 = arith.constant 1.000000e+00 : f32
    %50 = vector.broadcast %cst_14 : f32 to vector<1x128xf32>
    %51 = arith.addf %50, %49 : vector<1x128xf32>
    %52 = arith.divf %50, %51 : vector<1x128xf32>
    %53 = vector.extract_strided_slice %52 {offsets = [0, 0], sizes = [1, 32], strides = [1, 1]} : vector<1x128xf32> to vector<1x32xf32>
    %54 = vector.extract_strided_slice %52 {offsets = [0, 32], sizes = [1, 32], strides = [1, 1]} : vector<1x128xf32> to vector<1x32xf32>
    %55 = vector.extract_strided_slice %52 {offsets = [0, 96], sizes = [1, 32], strides = [1, 1]} : vector<1x128xf32> to vector<1x32xf32>
    %56 = vector.extract_strided_slice %47 {offsets = [0, 64], sizes = [1, 32], strides = [1, 1]} : vector<1x128xf32> to vector<1x32xf32>
    %57 = math.tanh %56 : vector<1x32xf32>
    %58 = arith.mulf %54, %42 : vector<1x32xf32>
    %59 = arith.mulf %53, %57 : vector<1x32xf32>
    %60 = arith.addf %58, %59 : vector<1x32xf32>
    %61 = math.tanh %60 : vector<1x32xf32>
    %62 = arith.mulf %55, %61 : vector<1x32xf32>
    %63 = vector.extract_strided_slice %5 {offsets = [3, 0], sizes = [1, 128], strides = [1, 1]} : vector<8x256xf32> to vector<1x128xf32>
    %cst_15 = arith.constant dense<0.000000e+00> : vector<1x128xf32>
    %64 = tpu.matmul %62, %8, %cst_15 {dimension_numbers = #tpu.dot_dimension_numbers<[1], [0], [0], [1], [0, 0, 1, 1], [], []>} : vector<1x32xf32>, vector<32x128xf32>, vector<1x128xf32> -> vector<1x128xf32>
    %65 = arith.addf %63, %64 : vector<1x128xf32>
    %66 = arith.negf %65 : vector<1x128xf32>
    %67 = math.exp %66 : vector<1x128xf32>
    %cst_16 = arith.constant 1.000000e+00 : f32
    %68 = vector.broadcast %cst_16 : f32 to vector<1x128xf32>
    %69 = arith.addf %68, %67 : vector<1x128xf32>
    %70 = arith.divf %68, %69 : vector<1x128xf32>
    %71 = vector.extract_strided_slice %70 {offsets = [0, 0], sizes = [1, 32], strides = [1, 1]} : vector<1x128xf32> to vector<1x32xf32>
    %72 = vector.extract_strided_slice %70 {offsets = [0, 32], sizes = [1, 32], strides = [1, 1]} : vector<1x128xf32> to vector<1x32xf32>
    %73 = vector.extract_strided_slice %70 {offsets = [0, 96], sizes = [1, 32], strides = [1, 1]} : vector<1x128xf32> to vector<1x32xf32>
    %74 = vector.extract_strided_slice %65 {offsets = [0, 64], sizes = [1, 32], strides = [1, 1]} : vector<1x128xf32> to vector<1x32xf32>
    %75 = math.tanh %74 : vector<1x32xf32>
    %76 = arith.mulf %72, %60 : vector<1x32xf32>
    %77 = arith.mulf %71, %75 : vector<1x32xf32>
    %78 = arith.addf %76, %77 : vector<1x32xf32>
    %79 = math.tanh %78 : vector<1x32xf32>
    %80 = arith.mulf %73, %79 : vector<1x32xf32>
    %81 = vector.extract_strided_slice %5 {offsets = [4, 0], sizes = [1, 128], strides = [1, 1]} : vector<8x256xf32> to vector<1x128xf32>
    %cst_17 = arith.constant dense<0.000000e+00> : vector<1x128xf32>
    %82 = tpu.matmul %80, %8, %cst_17 {dimension_numbers = #tpu.dot_dimension_numbers<[1], [0], [0], [1], [0, 0, 1, 1], [], []>} : vector<1x32xf32>, vector<32x128xf32>, vector<1x128xf32> -> vector<1x128xf32>
    %83 = arith.addf %81, %82 : vector<1x128xf32>
    %84 = arith.negf %83 : vector<1x128xf32>
    %85 = math.exp %84 : vector<1x128xf32>
    %cst_18 = arith.constant 1.000000e+00 : f32
    %86 = vector.broadcast %cst_18 : f32 to vector<1x128xf32>
    %87 = arith.addf %86, %85 : vector<1x128xf32>
    %88 = arith.divf %86, %87 : vector<1x128xf32>
    %89 = vector.extract_strided_slice %88 {offsets = [0, 0], sizes = [1, 32], strides = [1, 1]} : vector<1x128xf32> to vector<1x32xf32>
    %90 = vector.extract_strided_slice %88 {offsets = [0, 32], sizes = [1, 32], strides = [1, 1]} : vector<1x128xf32> to vector<1x32xf32>
    %91 = vector.extract_strided_slice %88 {offsets = [0, 96], sizes = [1, 32], strides = [1, 1]} : vector<1x128xf32> to vector<1x32xf32>
    %92 = vector.extract_strided_slice %83 {offsets = [0, 64], sizes = [1, 32], strides = [1, 1]} : vector<1x128xf32> to vector<1x32xf32>
    %93 = math.tanh %92 : vector<1x32xf32>
    %94 = arith.mulf %90, %78 : vector<1x32xf32>
    %95 = arith.mulf %89, %93 : vector<1x32xf32>
    %96 = arith.addf %94, %95 : vector<1x32xf32>
    %97 = math.tanh %96 : vector<1x32xf32>
    %98 = arith.mulf %91, %97 : vector<1x32xf32>
    %99 = vector.extract_strided_slice %5 {offsets = [5, 0], sizes = [1, 128], strides = [1, 1]} : vector<8x256xf32> to vector<1x128xf32>
    %cst_19 = arith.constant dense<0.000000e+00> : vector<1x128xf32>
    %100 = tpu.matmul %98, %8, %cst_19 {dimension_numbers = #tpu.dot_dimension_numbers<[1], [0], [0], [1], [0, 0, 1, 1], [], []>} : vector<1x32xf32>, vector<32x128xf32>, vector<1x128xf32> -> vector<1x128xf32>
    %101 = arith.addf %99, %100 : vector<1x128xf32>
    %102 = arith.negf %101 : vector<1x128xf32>
    %103 = math.exp %102 : vector<1x128xf32>
    %cst_20 = arith.constant 1.000000e+00 : f32
    %104 = vector.broadcast %cst_20 : f32 to vector<1x128xf32>
    %105 = arith.addf %104, %103 : vector<1x128xf32>
    %106 = arith.divf %104, %105 : vector<1x128xf32>
    %107 = vector.extract_strided_slice %106 {offsets = [0, 0], sizes = [1, 32], strides = [1, 1]} : vector<1x128xf32> to vector<1x32xf32>
    %108 = vector.extract_strided_slice %106 {offsets = [0, 32], sizes = [1, 32], strides = [1, 1]} : vector<1x128xf32> to vector<1x32xf32>
    %109 = vector.extract_strided_slice %106 {offsets = [0, 96], sizes = [1, 32], strides = [1, 1]} : vector<1x128xf32> to vector<1x32xf32>
    %110 = vector.extract_strided_slice %101 {offsets = [0, 64], sizes = [1, 32], strides = [1, 1]} : vector<1x128xf32> to vector<1x32xf32>
    %111 = math.tanh %110 : vector<1x32xf32>
    %112 = arith.mulf %108, %96 : vector<1x32xf32>
    %113 = arith.mulf %107, %111 : vector<1x32xf32>
    %114 = arith.addf %112, %113 : vector<1x32xf32>
    %115 = math.tanh %114 : vector<1x32xf32>
    %116 = arith.mulf %109, %115 : vector<1x32xf32>
    %117 = vector.extract_strided_slice %5 {offsets = [6, 0], sizes = [1, 128], strides = [1, 1]} : vector<8x256xf32> to vector<1x128xf32>
    %cst_21 = arith.constant dense<0.000000e+00> : vector<1x128xf32>
    %118 = tpu.matmul %116, %8, %cst_21 {dimension_numbers = #tpu.dot_dimension_numbers<[1], [0], [0], [1], [0, 0, 1, 1], [], []>} : vector<1x32xf32>, vector<32x128xf32>, vector<1x128xf32> -> vector<1x128xf32>
    %119 = arith.addf %117, %118 : vector<1x128xf32>
    %120 = arith.negf %119 : vector<1x128xf32>
    %121 = math.exp %120 : vector<1x128xf32>
    %cst_22 = arith.constant 1.000000e+00 : f32
    %122 = vector.broadcast %cst_22 : f32 to vector<1x128xf32>
    %123 = arith.addf %122, %121 : vector<1x128xf32>
    %124 = arith.divf %122, %123 : vector<1x128xf32>
    %125 = vector.extract_strided_slice %124 {offsets = [0, 0], sizes = [1, 32], strides = [1, 1]} : vector<1x128xf32> to vector<1x32xf32>
    %126 = vector.extract_strided_slice %124 {offsets = [0, 32], sizes = [1, 32], strides = [1, 1]} : vector<1x128xf32> to vector<1x32xf32>
    %127 = vector.extract_strided_slice %124 {offsets = [0, 96], sizes = [1, 32], strides = [1, 1]} : vector<1x128xf32> to vector<1x32xf32>
    %128 = vector.extract_strided_slice %119 {offsets = [0, 64], sizes = [1, 32], strides = [1, 1]} : vector<1x128xf32> to vector<1x32xf32>
    %129 = math.tanh %128 : vector<1x32xf32>
    %130 = arith.mulf %126, %114 : vector<1x32xf32>
    %131 = arith.mulf %125, %129 : vector<1x32xf32>
    %132 = arith.addf %130, %131 : vector<1x32xf32>
    %133 = math.tanh %132 : vector<1x32xf32>
    %134 = arith.mulf %127, %133 : vector<1x32xf32>
    %135 = vector.extract_strided_slice %5 {offsets = [7, 0], sizes = [1, 128], strides = [1, 1]} : vector<8x256xf32> to vector<1x128xf32>
    %cst_23 = arith.constant dense<0.000000e+00> : vector<1x128xf32>
    %136 = tpu.matmul %134, %8, %cst_23 {dimension_numbers = #tpu.dot_dimension_numbers<[1], [0], [0], [1], [0, 0, 1, 1], [], []>} : vector<1x32xf32>, vector<32x128xf32>, vector<1x128xf32> -> vector<1x128xf32>
    %137 = arith.addf %135, %136 : vector<1x128xf32>
    %138 = arith.negf %137 : vector<1x128xf32>
    %139 = math.exp %138 : vector<1x128xf32>
    %cst_24 = arith.constant 1.000000e+00 : f32
    %140 = vector.broadcast %cst_24 : f32 to vector<1x128xf32>
    %141 = arith.addf %140, %139 : vector<1x128xf32>
    %142 = arith.divf %140, %141 : vector<1x128xf32>
    %143 = vector.extract_strided_slice %142 {offsets = [0, 0], sizes = [1, 32], strides = [1, 1]} : vector<1x128xf32> to vector<1x32xf32>
    %144 = vector.extract_strided_slice %142 {offsets = [0, 32], sizes = [1, 32], strides = [1, 1]} : vector<1x128xf32> to vector<1x32xf32>
    %145 = vector.extract_strided_slice %142 {offsets = [0, 96], sizes = [1, 32], strides = [1, 1]} : vector<1x128xf32> to vector<1x32xf32>
    %146 = vector.extract_strided_slice %137 {offsets = [0, 64], sizes = [1, 32], strides = [1, 1]} : vector<1x128xf32> to vector<1x32xf32>
    %147 = math.tanh %146 : vector<1x32xf32>
    %148 = arith.mulf %144, %132 : vector<1x32xf32>
    %149 = arith.mulf %143, %147 : vector<1x32xf32>
    %150 = arith.addf %148, %149 : vector<1x32xf32>
    %151 = math.tanh %150 : vector<1x32xf32>
    %152 = arith.mulf %145, %151 : vector<1x32xf32>
    %153 = vector.extract_strided_slice %5 {offsets = [7, 128], sizes = [1, 128], strides = [1, 1]} : vector<8x256xf32> to vector<1x128xf32>
    %154 = arith.negf %153 : vector<1x128xf32>
    %155 = math.exp %154 : vector<1x128xf32>
    %cst_25 = arith.constant 1.000000e+00 : f32
    %156 = vector.broadcast %cst_25 : f32 to vector<1x128xf32>
    %157 = arith.addf %156, %155 : vector<1x128xf32>
    %158 = arith.divf %156, %157 : vector<1x128xf32>
    %159 = vector.extract_strided_slice %158 {offsets = [0, 0], sizes = [1, 32], strides = [1, 1]} : vector<1x128xf32> to vector<1x32xf32>
    %160 = vector.extract_strided_slice %158 {offsets = [0, 96], sizes = [1, 32], strides = [1, 1]} : vector<1x128xf32> to vector<1x32xf32>
    %161 = vector.extract_strided_slice %153 {offsets = [0, 64], sizes = [1, 32], strides = [1, 1]} : vector<1x128xf32> to vector<1x32xf32>
    %162 = math.tanh %161 : vector<1x32xf32>
    %163 = arith.mulf %159, %162 : vector<1x32xf32>
    %164 = math.tanh %163 : vector<1x32xf32>
    %165 = arith.mulf %160, %164 : vector<1x32xf32>
    %166 = tpu.concatenate %152, %165 in 1 : vector<1x32xf32>, vector<1x32xf32> -> vector<1x64xf32>
    %c0_26 = arith.constant 0 : index
    %c0_27 = arith.constant 0 : index
    %167 = vector.load %arg4[%c0_26, %c0_27] : memref<64x8xf32, #tpu.memory_space<vmem>>, vector<64x8xf32>
    %cst_28 = arith.constant dense<0.000000e+00> : vector<1x8xf32>
    %168 = tpu.matmul %166, %167, %cst_28 {dimension_numbers = #tpu.dot_dimension_numbers<[1], [0], [0], [1], [0, 0, 1, 1], [], []>} : vector<1x64xf32>, vector<64x8xf32>, vector<1x8xf32> -> vector<1x8xf32>
    %c0_29 = arith.constant 0 : index
    %c0_30 = arith.constant 0 : index
    %169 = vector.load %arg5[%c0_29, %c0_30] : memref<1x8xf32, #tpu.memory_space<vmem>>, vector<1x8xf32>
    %170 = arith.addf %168, %169 : vector<1x8xf32>
    %cst_31 = arith.constant dense<0xFF800000> : vector<1xf32>
    %171 = vector.multi_reduction <maximumf>, %170, %cst_31 [1] : vector<1x8xf32> to vector<1xf32>
    %172 = vector.shape_cast %171 : vector<1xf32> to vector<1x1xf32>
    %173 = vector.broadcast %172 : vector<1x1xf32> to vector<1x8xf32>
    %174 = arith.subf %170, %173 : vector<1x8xf32>
    %175 = math.exp %174 : vector<1x8xf32>
    %cst_32 = arith.constant dense<0.000000e+00> : vector<1xf32>
    %176 = vector.multi_reduction <add>, %175, %cst_32 [1] : vector<1x8xf32> to vector<1xf32>
    %177 = vector.shape_cast %176 : vector<1xf32> to vector<1x1xf32>
    %178 = math.log %177 : vector<1x1xf32>
    %179 = vector.broadcast %178 : vector<1x1xf32> to vector<1x8xf32>
    %180 = arith.subf %174, %179 : vector<1x8xf32>
    %c0_33 = arith.constant 0 : index
    %c0_34 = arith.constant 0 : index
    %181 = vector.load %arg6[%c0_33, %c0_34] : memref<1x8xf32, #tpu.memory_space<vmem>>, vector<1x8xf32>
    tpu.vector_store %arg6[%c0_33, %c0_34], %180 {strides = array<i32>} : memref<1x8xf32, #tpu.memory_space<vmem>>, vector<1x8xf32>,
    return
  }
}

</mosaic_0001>

<bundles_post_ra>
// kernel: tpu_custom_call.1
= control target key start
LH: loop header
LB: loop body
LE: loop exit
PB: predicated region body
PF: predicated region fallthrough
CT: control target
= control target key end

     0   :  { %11 = vsyncpa [#allocation3], 0  ;;  %s1174_s0 = inlined_call_operand.vmem [shape: f32[8,32], index: 0, kind: input, shape index: {}]   ;;  %s1175_s1 = inlined_call_operand.vmem [shape: f32[32,256], index: 1, kind: input, shape index: {}]   ;;  %s1176_s2 = inlined_call_operand.hbm [shape: f32[1,256], index: 2, kind: input, shape index: {}]   ;;  %s1177_s3 = inlined_call_operand.hbm [shape: f32[32,128], index: 3, kind: input, shape index: {}]   ;;  %s1178_s4 = inlined_call_operand.vmem [shape: f32[64,8], index: 4, kind: input, shape index: {}]   ;;  %s1179_s5 = inlined_call_operand.vmem [shape: f32[1,8], index: 5, kind: input, shape index: {}]   ;;  %s1180_s6 = inlined_call_operand.hbm [shape: f32[1,8], index: 6, kind: output, shape index: {}]  }
   0x1   :  { %12 = vsyncpa [#allocation6], 0 }
   0x2   :  { %13 = vsyncpa [#allocation4], 0  ;;  %s23_s23 = sshll.u32 %s1176_s2, 4  ;;  %s955_s24 = smov [#allocation2]   ;;  %s24_s23 = int_to_ptr.hbm [resolvable:$true] %s23_s23 }
   0x3   :  { %s25_s25 = sshll.u32 %s955_s24, 4  ;;  %s33_s28 = sshll.u32 %s1177_s3, 4  ;;  %s26_s25 = int_to_ptr.vmem [resolvable:$true] %s25_s25  ;;  %s34_s28 = int_to_ptr.hbm [resolvable:$true] %s33_s28 }
   0x4   :  { %28 = dma.hbm_to_vmem [thread:$0]  %s24_s23, 32, %s26_s25, [#allocation3]  }
   0x5   :  { %s956_s29 = smov [#allocation5]   ;;  %s957_s7 = smov 128  }
   0x6   :  { %s35_s30 = sshll.u32 %s956_s29, 4  ;;  %s958_s8 = smov 8   ;;  %s36_s30 = int_to_ptr.vmem [resolvable:$true] %s35_s30 }
   0x7   :  { %41 = dma.hbm_to_vmem [thread:$0]  %s34_s28, 512, %s36_s30, [#allocation6], %s957_s7, %s957_s7, %s958_s8  }
   0x8   :  { %949 = dma.done.wait [#allocation3], 32  }
   0x9   :  { %950 = vsyncadd [#allocation3], 4294967264 }
   0xa   :  { %951 = dma.done.wait [#allocation6], 512  }
   0xb   :  { %952 = vsyncadd [#allocation6], 4294966784  ;;  %v1005_v0 = vld [vmem:[#allocation5 + $0x18] sm:$0xff]  ;;  %v1007_v1 = vld [vmem:[#allocation5 + $0x10] sm:$0xff]  ;;  %vm69_vm0 = vcmask 261120   ;;  %v959_v9 = vmov 0.0  }
   0xc   :  { %v61_v2 = vld [vmem:[%s1175_s1 + $0x30] sm:$0xff]  ;;  %132 = vmatpush.msra.mxu3 %v1005_v0  ;;  %v59_v3 = vld [vmem:[%s1175_s1 + $0x20] sm:$0xff]  ;;  %405 = vmatpush.msra.mxu2 %v1005_v0  ;;  %s961_s17 = smov 32   ;;  %s762_s19 = sshll.u32 %s1180_s6, 4  ;;  %s763_s19 = int_to_ptr.hbm [resolvable:$true] %s762_s19 }
   0xd   :  { %85 = vmatpush.msra.mxu0 %v61_v2  ;;  %v1016_v4 = vld [vmem:[#allocation5 + $0x8] sm:$0xff]  ;;  %v1023_v6 = vld [vmem:[#allocation5] sm:$0xff]  ;;  %v1056_v10 = vld [vmem:[#allocation2] sm:$0x3] }
   0xe   :  { %v57_v5 = vld [vmem:[%s1175_s1 + $0x10] sm:$0xff]  ;;  %133 = vmatpush.msra.mxu3 %v1007_v1  ;;  %v55_v7 = vld [vmem:[%s1175_s1] sm:$0xff]  ;;  %406 = vmatpush.msra.mxu2 %v1007_v1  ;;  %v65_v11 = vperm.slane %v1056_v10, 0 }
   0xf   :  { %86 = vmatpush.msra.mxu0 %v59_v3  ;;  %v1033_v8 = vld [vmem:[%s1174_s0] sm:$0xff]  ;;  %s960_s0 = smov 64  }
  0x10   :  { %134 = vmatpush.msra.mxu3 %v1016_v4  ;;  %407 = vmatpush.msra.mxu2 %v1016_v4 }
  0x11   :  { %87 = vmatpush.msra.mxu0 %v57_v5 }
  0x12   :  { %135 = vmatpush.msra.mxu3 %v1023_v6  ;;  %408 = vmatpush.msra.mxu2 %v1023_v6 }
  0x13   :  { %88 = vmatpush.msra.mxu0 %v55_v7  ;;  %136 = vmatmul.f32.vlgmr.msra.gmra.mxu3 %v959_v9 }
  0x14   :  { %773 = vmatmul.msk.f32.vlgmr.msra.gmra.mxu0 %vm69_vm0, %v1033_v8  ;;  %195 = vmatpush.msrb.mxu3 %v1005_v0 }
  0x15   :  { %265 = vmatpush.msrb.mxu0 %v1005_v0 }
  0x16   :  { %196 = vmatpush.msrb.mxu3 %v1007_v1 }
  0x17   :  { %266 = vmatpush.msrb.mxu0 %v1007_v1 }
  0x18   :  { %197 = vmatpush.msrb.mxu3 %v1016_v4 }
  0x19   :  { %267 = vmatpush.msrb.mxu0 %v1016_v4 }
  0x1a   :  { %198 = vmatpush.msrb.mxu3 %v1023_v6 }
  0x1b   :  { %268 = vmatpush.msrb.mxu0 %v1023_v6 }
  0x1c   :  { %475 = vmatpush.msra.mxu3 %v1005_v0 }
  0x1d   :  { %545 = vmatpush.msra.mxu0 %v1005_v0 }
  0x1e   :  { %476 = vmatpush.msra.mxu3 %v1007_v1 }
  0x1f   :  { %546 = vmatpush.msra.mxu0 %v1007_v1 }
  0x20   :  { %477 = vmatpush.msra.mxu3 %v1016_v4 }
  0x21   :  { %547 = vmatpush.msra.mxu0 %v1016_v4 }
  0x22   :  { %478 = vmatpush.msra.mxu3 %v1023_v6 }
  0x23   :  { %548 = vmatpush.msra.mxu0 %v1023_v6 }
  0x91   :  { %v90_v12 = vpop.f32.mrf.mxu0 }
  0x92   :  { %v1059_v13 = vadd.f32 %v90_v12, %v65_v11 }
  0x96   :  { %v137_v14 = vpop.f32.mrf.mxu3 }
  0x97   :  { %v140_v15 = vadd.f32 %v137_v14, %v1059_v13 }
  0x99   :  { %801 = vtanh.f32 %v140_v15  ;;  %v775_v17 = vmul.f32 -1.442695, %v140_v15 }
  0x9b   :  { %803 = vpow2.f32 %v775_v17 }
  0x9f   :  { %v802_v16 = vpop.eup %801 }
  0xa0   :  { %163 = vrot.lane.b32.xlu0 %v802_v16, %s960_s0 }
  0xa1   :  { %v804_v18 = vpop.eup %803 }
  0xa2   :  { %v144_v19 = vadd.f32 1.0, %v804_v18 }
  0xa4   :  { %805 = vrcp.f32 %v144_v19  ;;  %v156_v25 = vand.u32 2147483648, %v144_v19  ;;  %vm150_vm2 = vweird.f32 %v144_v19  ;;  %v154_v26 = vand.u32 2147483647, %v144_v19 }
  0xa6   :  { %v157_v28 = vor.u32 1.1754944e-38, %v156_v25  ;;  %vm155_vm4 = vcmp.eq.f32.partialorder %v154_v26, 8.507059e+37 }
  0xaa   :  { %v806_v20 = vpop.eup %805 }
  0xab   :  { %v146_v21 = vmul.f32 %v806_v20, %v144_v19  ;;  %vm151_vm1 = vweird.f32 %v806_v20 }
  0xac   :  { %vm152_vm3 = vmor %vm150_vm2, %vm151_vm1 }
  0xad   :  { %v147_v22 = vsub.f32 1.0, %v146_v21 }
  0xaf   :  { %v148_v23 = vmul.f32 %v806_v20, %v147_v22 }
  0xb1   :  { %v149_v24 = vadd.f32 %v806_v20, %v148_v23 }
  0xb3   :  { %v153_v27 = vsel %vm152_vm3, %v806_v20, %v149_v24 }
  0xb4   :  { %v158_v30 = vsel %vm155_vm4, %v157_v28, %v153_v27 }
  0xb5   :  { %v161_v32 = vmul.f32 0.0, %v158_v30 }
 0x112   :  { %v164_v29 = vpop.permute.xlu0 %163 }
 0x113   :  { %v166_v31 = vmul.f32 %v164_v29, %v158_v30 }
 0x115   :  { %168 = vrot.lane.b32.xlu0 %v166_v31, %s961_s17 }
 0x187   :  { %v169_v33 = vpop.permute.xlu0 %168 }
 0x188   :  { %v171_v34 = vadd.f32 %v169_v33, %v161_v32 }
 0x18a   :  { %807 = vtanh.f32 %v171_v34  ;;  %v228_v58 = vrot.slane %v171_v34, 7  ;;  %v62_v34 = vld [vmem:[%s1175_s1 + $0x38] sm:$0xff] }
 0x18b   :  { %105 = vmatpush.msra.mxu1 %v62_v34 }
 0x190   :  { %v808_v35 = vpop.eup %807 }
 0x191   :  { %174 = vrot.lane.b32.xlu1 %v808_v35, %s960_s0  ;;  %v60_v35 = vld [vmem:[%s1175_s1 + $0x28] sm:$0xff] }
 0x192   :  { %106 = vmatpush.msra.mxu1 %v60_v35 }
 0x203   :  { %v175_v36 = vpop.permute.xlu1 %174 }
 0x204   :  { %v177_v37 = vmul.f32 %v175_v36, %v158_v30  ;;  %v58_v36 = vld [vmem:[%s1175_s1 + $0x18] sm:$0xff] }
 0x205   :  { %107 = vmatpush.msra.mxu1 %v58_v36 }
 0x206   :  { %179 = vrot.lane.b32.xlu1 %v177_v37, %s961_s17  ;;  %v56_v37 = vld [vmem:[%s1175_s1 + $0x8] sm:$0xff]  ;;  %s962_s1 = smov 96  }
 0x207   :  { %108 = vmatpush.msra.mxu1 %v56_v37 }
 0x208   :  { %774 = vmatmul.msk.f32.vlgmr.msra.gmra.mxu1 %vm69_vm0, %v1033_v8 }
 0x209   :  { %335 = vmatpush.msrb.mxu1 %v1005_v0 }
 0x20b   :  { %336 = vmatpush.msrb.mxu1 %v1007_v1 }
 0x20d   :  { %337 = vmatpush.msrb.mxu1 %v1016_v4 }
 0x20f   :  { %338 = vmatpush.msrb.mxu1 %v1023_v6 }
 0x211   :  { %615 = vmatpush.msra.mxu1 %v1005_v0 }
 0x213   :  { %616 = vmatpush.msra.mxu1 %v1007_v1 }
 0x215   :  { %617 = vmatpush.msra.mxu1 %v1016_v4 }
 0x217   :  { %618 = vmatpush.msra.mxu1 %v1023_v6 }
 0x278   :  { %v180_v38 = vpop.permute.xlu1 %179 }
 0x279   :  { %776 = vmatmul.msk.f32.vlgmr.msrb.gmra.mxu3 %vm69_vm0, %v180_v38 }
 0x2fc   :  { %v200_v39 = vpop.f32.mrf.mxu3 }
 0x2fd   :  { %v204_v40 = vrot.slane %v200_v39, 7 }
 0x2ff   :  { %v206_v41 = vadd.f32 %v204_v40, %v1059_v13 }
 0x301   :  { %809 = vtanh.f32 %v206_v41  ;;  %v777_v43 = vmul.f32 -1.442695, %v206_v41  ;;  %v1101_v41 = vpop.f32.mrf.mxu1 }
 0x303   :  { %811 = vpow2.f32 %v777_v43 }
 0x307   :  { %v810_v42 = vpop.eup %809 }
 0x308   :  { %232 = vrot.lane.b32.xlu2 %v810_v42, %s960_s0 }
 0x309   :  { %v812_v44 = vpop.eup %811 }
 0x30a   :  { %v210_v45 = vadd.f32 1.0, %v812_v44 }
 0x30c   :  { %813 = vrcp.f32 %v210_v45  ;;  %v222_v51 = vand.u32 2147483648, %v210_v45  ;;  %vm216_vm6 = vweird.f32 %v210_v45  ;;  %v220_v52 = vand.u32 2147483647, %v210_v45 }
 0x30e   :  { %v223_v54 = vor.u32 1.1754944e-38, %v222_v51  ;;  %vm221_vm8 = vcmp.eq.f32.partialorder %v220_v52, 8.507059e+37 }
 0x312   :  { %v814_v46 = vpop.eup %813 }
 0x313   :  { %v212_v47 = vmul.f32 %v814_v46, %v210_v45  ;;  %vm217_vm5 = vweird.f32 %v814_v46 }
 0x314   :  { %vm218_vm7 = vmor %vm216_vm6, %vm217_vm5 }
 0x315   :  { %v213_v48 = vsub.f32 1.0, %v212_v47 }
 0x317   :  { %v214_v49 = vmul.f32 %v814_v46, %v213_v48 }
 0x319   :  { %v215_v50 = vadd.f32 %v814_v46, %v214_v49 }
 0x31b   :  { %v219_v53 = vsel %vm218_vm7, %v814_v46, %v215_v50 }
 0x31c   :  { %v224_v56 = vsel %vm221_vm8, %v223_v54, %v219_v53 }
 0x31d   :  { %v230_v59 = vmul.f32 %v228_v58, %v224_v56 }
 0x362   :  { %v233_v55 = vpop.permute.xlu2 %232 }
 0x363   :  { %v235_v57 = vmul.f32 %v233_v55, %v224_v56 }
 0x365   :  { %237 = vrot.lane.b32.xlu2 %v235_v57, %s961_s17 }
 0x3bf   :  { %v238_v60 = vpop.permute.xlu2 %237 }
 0x3c0   :  { %v240_v61 = vadd.f32 %v238_v60, %v230_v59 }
 0x3c2   :  { %815 = vtanh.f32 %v240_v61  ;;  %v298_v29 = vrot.slane %v240_v61, 7 }
 0x3c8   :  { %v816_v62 = vpop.eup %815 }
 0x3c9   :  { %243 = vrot.lane.b32.xlu0 %v816_v62, %s960_s0 }
 0x43b   :  { %v244_v63 = vpop.permute.xlu0 %243 }
 0x43c   :  { %v246_v2 = vmul.f32 %v244_v63, %v224_v56 }
 0x43e   :  { %v248_v3 = vrot.slane %v246_v2, 1 }
 0x440   :  { %249 = vrot.lane.b32.xlu1 %v248_v3, %s961_s17 }
 0x4b2   :  { %v250_v5 = vpop.permute.xlu1 %249 }
 0x4b3   :  { %778 = vmatmul.msk.f32.vlgmr.msrb.gmra.mxu0 %vm69_vm0, %v250_v5 }
 0x530   :  { %v270_v7 = vpop.f32.mrf.mxu0 }
 0x531   :  { %v274_v9 = vrot.slane %v270_v7, 6 }
 0x533   :  { %v276_v11 = vadd.f32 %v274_v9, %v1059_v13 }
 0x535   :  { %817 = vtanh.f32 %v276_v11  ;;  %v779_v14 = vmul.f32 -1.442695, %v276_v11 }
 0x537   :  { %819 = vpow2.f32 %v779_v14 }
 0x53b   :  { %v818_v12 = vpop.eup %817 }
 0x53c   :  { %302 = vrot.lane.b32.xlu2 %v818_v12, %s960_s0 }
 0x53d   :  { %v820_v15 = vpop.eup %819 }
 0x53e   :  { %v280_v16 = vadd.f32 1.0, %v820_v15 }
 0x540   :  { %821 = vrcp.f32 %v280_v16  ;;  %v292_v22 = vand.u32 2147483648, %v280_v16  ;;  %vm286_vm10 = vweird.f32 %v280_v16  ;;  %v290_v23 = vand.u32 2147483647, %v280_v16 }
 0x542   :  { %v293_v25 = vor.u32 1.1754944e-38, %v292_v22  ;;  %vm291_vm12 = vcmp.eq.f32.partialorder %v290_v23, 8.507059e+37 }
 0x546   :  { %v822_v17 = vpop.eup %821 }
 0x547   :  { %v282_v18 = vmul.f32 %v822_v17, %v280_v16  ;;  %vm287_vm9 = vweird.f32 %v822_v17 }
 0x548   :  { %vm288_vm11 = vmor %vm286_vm10, %vm287_vm9 }
 0x549   :  { %v283_v19 = vsub.f32 1.0, %v282_v18 }
 0x54b   :  { %v284_v20 = vmul.f32 %v822_v17, %v283_v19 }
 0x54d   :  { %v285_v21 = vadd.f32 %v822_v17, %v284_v20 }
 0x54f   :  { %v289_v24 = vsel %vm288_vm11, %v822_v17, %v285_v21 }
 0x550   :  { %v294_v27 = vsel %vm291_vm12, %v293_v25, %v289_v24 }
 0x551   :  { %v300_v30 = vmul.f32 %v298_v29, %v294_v27 }
 0x596   :  { %v303_v26 = vpop.permute.xlu2 %302 }
 0x597   :  { %v305_v28 = vmul.f32 %v303_v26, %v294_v27 }
 0x599   :  { %307 = vrot.lane.b32.xlu0 %v305_v28, %s961_s17 }
 0x60b   :  { %v308_v31 = vpop.permute.xlu0 %307 }
 0x60c   :  { %v310_v32 = vadd.f32 %v308_v31, %v300_v30 }
 0x60e   :  { %823 = vtanh.f32 %v310_v32  ;;  %v368_v57 = vrot.slane %v310_v32, 7 }
 0x614   :  { %v824_v33 = vpop.eup %823 }
 0x615   :  { %313 = vrot.lane.b32.xlu1 %v824_v33, %s960_s0 }
 0x687   :  { %v314_v38 = vpop.permute.xlu1 %313 }
 0x688   :  { %v316_v39 = vmul.f32 %v314_v38, %v294_v27 }
 0x68a   :  { %v318_v40 = vrot.slane %v316_v39, 2 }
 0x68c   :  { %319 = vrot.lane.b32.xlu2 %v318_v40, %s961_s17 }
 0x6e6   :  { %v320_v8 = vpop.permute.xlu2 %319 }
 0x6e7   :  { %780 = vmatmul.msk.f32.vlgmr.msrb.gmra.mxu1 %vm69_vm0, %v320_v8 }
 0x764   :  { %v340_v42 = vpop.f32.mrf.mxu1 }
 0x765   :  { %v344_v43 = vrot.slane %v340_v42, 5 }
 0x767   :  { %v346_v0 = vadd.f32 %v344_v43, %v1059_v13 }
 0x769   :  { %825 = vtanh.f32 %v346_v0  ;;  %v781_v4 = vmul.f32 -1.442695, %v346_v0 }
 0x76b   :  { %827 = vpow2.f32 %v781_v4 }
 0x76f   :  { %v826_v1 = vpop.eup %825 }
 0x770   :  { %372 = vrot.lane.b32.xlu0 %v826_v1, %s960_s0 }
 0x771   :  { %v828_v6 = vpop.eup %827 }
 0x772   :  { %v350_v44 = vadd.f32 1.0, %v828_v6 }
 0x774   :  { %829 = vrcp.f32 %v350_v44  ;;  %v362_v50 = vand.u32 2147483648, %v350_v44  ;;  %vm356_vm14 = vweird.f32 %v350_v44  ;;  %v360_v51 = vand.u32 2147483647, %v350_v44 }
 0x776   :  { %v363_v53 = vor.u32 1.1754944e-38, %v362_v50  ;;  %vm361_vm1 = vcmp.eq.f32.partialorder %v360_v51, 8.507059e+37 }
 0x77a   :  { %v830_v45 = vpop.eup %829 }
 0x77b   :  { %v352_v46 = vmul.f32 %v830_v45, %v350_v44  ;;  %vm357_vm13 = vweird.f32 %v830_v45 }
 0x77c   :  { %vm358_vm15 = vmor %vm356_vm14, %vm357_vm13 }
 0x77d   :  { %v353_v47 = vsub.f32 1.0, %v352_v46 }
 0x77f   :  { %v354_v48 = vmul.f32 %v830_v45, %v353_v47 }
 0x781   :  { %v355_v49 = vadd.f32 %v830_v45, %v354_v48 }
 0x783   :  { %v359_v52 = vsel %vm358_vm15, %v830_v45, %v355_v49 }
 0x784   :  { %v364_v55 = vsel %vm361_vm1, %v363_v53, %v359_v52 }
 0x785   :  { %v370_v58 = vmul.f32 %v368_v57, %v364_v55 }
 0x7e2   :  { %v373_v54 = vpop.permute.xlu0 %372 }
 0x7e3   :  { %v375_v56 = vmul.f32 %v373_v54, %v364_v55 }
 0x7e5   :  { %377 = vrot.lane.b32.xlu1 %v375_v56, %s961_s17 }
 0x857   :  { %v378_v59 = vpop.permute.xlu1 %377 }
 0x858   :  { %v380_v60 = vadd.f32 %v378_v59, %v370_v58 }
 0x85a   :  { %831 = vtanh.f32 %v380_v60  ;;  %v438_v28 = vrot.slane %v380_v60, 7 }
 0x860   :  { %v832_v61 = vpop.eup %831 }
 0x861   :  { %383 = vrot.lane.b32.xlu2 %v832_v61, %s960_s0 }
 0x8bb   :  { %v384_v62 = vpop.permute.xlu2 %383 }
 0x8bc   :  { %v386_v63 = vmul.f32 %v384_v62, %v364_v55 }
 0x8be   :  { %v388_v2 = vrot.slane %v386_v63, 3 }
 0x8c0   :  { %389 = vrot.lane.b32.xlu0 %v388_v2, %s961_s17 }
 0x932   :  { %v390_v3 = vpop.permute.xlu0 %389 }
 0x933   :  { %782 = vmatmul.msk.f32.vlgmr.msra.gmra.mxu2 %vm69_vm0, %v390_v3 }
 0x9b6   :  { %v410_v5 = vpop.f32.mrf.mxu2 }
 0x9b7   :  { %v414_v7 = vrot.slane %v410_v5, 4 }
 0x9b9   :  { %v416_v9 = vadd.f32 %v414_v7, %v1059_v13 }
 0x9bb   :  { %833 = vtanh.f32 %v416_v9  ;;  %v783_v12 = vmul.f32 -1.442695, %v416_v9 }
 0x9bd   :  { %835 = vpow2.f32 %v783_v12 }
 0x9c1   :  { %v834_v11 = vpop.eup %833 }
 0x9c2   :  { %442 = vrot.lane.b32.xlu1 %v834_v11, %s960_s0 }
 0x9c3   :  { %v836_v14 = vpop.eup %835 }
 0x9c4   :  { %v420_v15 = vadd.f32 1.0, %v836_v14 }
 0x9c6   :  { %837 = vrcp.f32 %v420_v15  ;;  %v432_v21 = vand.u32 2147483648, %v420_v15  ;;  %vm426_vm3 = vweird.f32 %v420_v15  ;;  %v430_v22 = vand.u32 2147483647, %v420_v15 }
 0x9c8   :  { %v433_v24 = vor.u32 1.1754944e-38, %v432_v21  ;;  %vm431_vm5 = vcmp.eq.f32.partialorder %v430_v22, 8.507059e+37 }
 0x9cc   :  { %v838_v16 = vpop.eup %837 }
 0x9cd   :  { %v422_v17 = vmul.f32 %v838_v16, %v420_v15  ;;  %vm427_vm2 = vweird.f32 %v838_v16 }
 0x9ce   :  { %vm428_vm4 = vmor %vm426_vm3, %vm427_vm2 }
 0x9cf   :  { %v423_v18 = vsub.f32 1.0, %v422_v17 }
 0x9d1   :  { %v424_v19 = vmul.f32 %v838_v16, %v423_v18 }
 0x9d3   :  { %v425_v20 = vadd.f32 %v838_v16, %v424_v19 }
 0x9d5   :  { %v429_v23 = vsel %vm428_vm4, %v838_v16, %v425_v20 }
 0x9d6   :  { %v434_v26 = vsel %vm431_vm5, %v433_v24, %v429_v23 }
 0x9d7   :  { %v440_v29 = vmul.f32 %v438_v28, %v434_v26  ;;  %v66_v28 = vperm.slane %v1056_v10, 1 }
 0xa34   :  { %v443_v25 = vpop.permute.xlu1 %442 }
 0xa35   :  { %v445_v27 = vmul.f32 %v443_v25, %v434_v26 }
 0xa37   :  { %447 = vrot.lane.b32.xlu2 %v445_v27, %s961_s17 }
 0xa91   :  { %v448_v30 = vpop.permute.xlu2 %447 }
 0xa92   :  { %v450_v31 = vadd.f32 %v448_v30, %v440_v29 }
 0xa94   :  { %839 = vtanh.f32 %v450_v31  ;;  %v508_v52 = vrot.slane %v450_v31, 7 }
 0xa9a   :  { %v840_v32 = vpop.eup %839 }
 0xa9b   :  { %453 = vrot.lane.b32.xlu0 %v840_v32, %s960_s0  ;;  %v111_v32 = vadd.f32 %v1101_v41, %v66_v28 }
 0xb0d   :  { %v454_v33 = vpop.permute.xlu0 %453 }
 0xb0e   :  { %v456_v34 = vmul.f32 %v454_v33, %v434_v26 }
 0xb10   :  { %v458_v35 = vrot.slane %v456_v34, 4 }
 0xb12   :  { %459 = vrot.lane.b32.xlu1 %v458_v35, %s961_s17 }
 0xb84   :  { %v460_v36 = vpop.permute.xlu1 %459 }
 0xb85   :  { %784 = vmatmul.msk.f32.vlgmr.msra.gmra.mxu3 %vm69_vm0, %v460_v36 }
 0xc08   :  { %v480_v37 = vpop.f32.mrf.mxu3 }
 0xc09   :  { %v484_v38 = vrot.slane %v480_v37, 3 }
 0xc0b   :  { %v486_v39 = vadd.f32 %v484_v38, %v1059_v13  ;;  %v790_v38 = vmul.f32 -1.442695, %v111_v32 }
 0xc0d   :  { %841 = vtanh.f32 %v486_v39  ;;  %v785_v8 = vmul.f32 -1.442695, %v486_v39 }
 0xc0f   :  { %843 = vpow2.f32 %v785_v8 }
 0xc13   :  { %v842_v40 = vpop.eup %841 }
 0xc14   :  { %512 = vrot.lane.b32.xlu2 %v842_v40, %s960_s0 }
 0xc15   :  { %v844_v42 = vpop.eup %843 }
 0xc16   :  { %v490_v43 = vadd.f32 1.0, %v844_v42 }
 0xc18   :  { %845 = vrcp.f32 %v490_v43  ;;  %v502_v45 = vand.u32 2147483648, %v490_v43  ;;  %vm496_vm7 = vweird.f32 %v490_v43  ;;  %v500_v46 = vand.u32 2147483647, %v490_v43 }
 0xc1a   :  { %v503_v48 = vor.u32 1.1754944e-38, %v502_v45  ;;  %vm501_vm9 = vcmp.eq.f32.partialorder %v500_v46, 8.507059e+37 }
 0xc1e   :  { %v846_v0 = vpop.eup %845 }
 0xc1f   :  { %v492_v1 = vmul.f32 %v846_v0, %v490_v43  ;;  %vm497_vm6 = vweird.f32 %v846_v0 }
 0xc20   :  { %vm498_vm8 = vmor %vm496_vm7, %vm497_vm6  ;;  %vm718_vm7 = vcmask 523264  }
 0xc21   :  { %v493_v4 = vsub.f32 1.0, %v492_v1 }
 0xc23   :  { %v494_v6 = vmul.f32 %v846_v0, %v493_v4 }
 0xc25   :  { %v495_v44 = vadd.f32 %v846_v0, %v494_v6 }
 0xc27   :  { %v499_v47 = vsel %vm498_vm8, %v846_v0, %v495_v44  ;;  %vm741_vm8 = vcmask 57344  }
 0xc28   :  { %v504_v50 = vsel %vm501_vm9, %v503_v48, %v499_v47 }
 0xc29   :  { %v510_v53 = vmul.f32 %v508_v52, %v504_v50 }
 0xc6e   :  { %v513_v49 = vpop.permute.xlu2 %512 }
 0xc6f   :  { %v515_v51 = vmul.f32 %v513_v49, %v504_v50 }
 0xc71   :  { %517 = vrot.lane.b32.xlu0 %v515_v51, %s961_s17 }
 0xce3   :  { %v518_v54 = vpop.permute.xlu0 %517 }
 0xce4   :  { %v520_v55 = vadd.f32 %v518_v54, %v510_v53 }
 0xce6   :  { %847 = vtanh.f32 %v520_v55  ;;  %v578_v23 = vrot.slane %v520_v55, 7 }
 0xcec   :  { %v848_v56 = vpop.eup %847 }
 0xced   :  { %523 = vrot.lane.b32.xlu1 %v848_v56, %s960_s0 }
 0xd5f   :  { %v524_v57 = vpop.permute.xlu1 %523 }
 0xd60   :  { %v526_v58 = vmul.f32 %v524_v57, %v504_v50 }
 0xd62   :  { %v528_v59 = vrot.slane %v526_v58, 5 }
 0xd64   :  { %529 = vrot.lane.b32.xlu2 %v528_v59, %s961_s17 }
 0xdbe   :  { %v530_v60 = vpop.permute.xlu2 %529 }
 0xdbf   :  { %786 = vmatmul.msk.f32.vlgmr.msra.gmra.mxu0 %vm69_vm0, %v530_v60 }
 0xe3c   :  { %v550_v61 = vpop.f32.mrf.mxu0 }
 0xe3d   :  { %v554_v62 = vrot.slane %v550_v61, 2 }
 0xe3f   :  { %v556_v63 = vadd.f32 %v554_v62, %v1059_v13 }
 0xe41   :  { %849 = vtanh.f32 %v556_v63  ;;  %v787_v3 = vmul.f32 -1.442695, %v556_v63 }
 0xe43   :  { %851 = vpow2.f32 %v787_v3 }
 0xe47   :  { %v850_v2 = vpop.eup %849 }
 0xe48   :  { %582 = vrot.lane.b32.xlu0 %v850_v2, %s960_s0 }
 0xe49   :  { %v852_v5 = vpop.eup %851 }
 0xe4a   :  { %v560_v7 = vadd.f32 1.0, %v852_v5 }
 0xe4c   :  { %853 = vrcp.f32 %v560_v7  ;;  %v572_v16 = vand.u32 2147483648, %v560_v7  ;;  %vm566_vm11 = vweird.f32 %v560_v7  ;;  %v570_v17 = vand.u32 2147483647, %v560_v7 }
 0xe4e   :  { %v573_v19 = vor.u32 1.1754944e-38, %v572_v16  ;;  %vm571_vm13 = vcmp.eq.f32.partialorder %v570_v17, 8.507059e+37  ;;  %v711_v16 = vld [vmem:[%s1178_s4 + $0x20] sm:$0xff]  ;;  %v710_v17 = vld [vmem:[%s1178_s4 + $0x18] sm:$0xff] }
 0xe52   :  { %v854_v9 = vpop.eup %853 }
 0xe53   :  { %v562_v11 = vmul.f32 %v854_v9, %v560_v7  ;;  %vm567_vm10 = vweird.f32 %v854_v9 }
 0xe54   :  { %vm568_vm12 = vmor %vm566_vm11, %vm567_vm10 }
 0xe55   :  { %v563_v12 = vsub.f32 1.0, %v562_v11 }
 0xe57   :  { %v564_v14 = vmul.f32 %v854_v9, %v563_v12  ;;  %v714_v12 = vld [vmem:[%s1178_s4 + $0x38] sm:$0xff] }
 0xe58   :  { %729 = vmatpush.msrb.mxu2 %v714_v12 }
 0xe59   :  { %v565_v15 = vadd.f32 %v854_v9, %v564_v14  ;;  %v713_v14 = vld [vmem:[%s1178_s4 + $0x30] sm:$0xff] }
 0xe5a   :  { %730 = vmatpush.msrb.mxu2 %v713_v14 }
 0xe5b   :  { %v569_v18 = vsel %vm568_vm12, %v854_v9, %v565_v15  ;;  %v712_v15 = vld [vmem:[%s1178_s4 + $0x28] sm:$0xff] }
 0xe5c   :  { %v574_v21 = vsel %vm571_vm13, %v573_v19, %v569_v18  ;;  %731 = vmatpush.msrb.mxu2 %v712_v15  ;;  %v709_v18 = vld [vmem:[%s1178_s4 + $0x10] sm:$0xff] }
 0xe5d   :  { %v580_v24 = vmul.f32 %v578_v23, %v574_v21 }
 0xe5e   :  { %732 = vmatpush.msrb.mxu2 %v711_v16 }
 0xe60   :  { %733 = vmatpush.msrb.mxu2 %v710_v17 }
 0xe62   :  { %734 = vmatpush.msrb.mxu2 %v709_v18 }
 0xeba   :  { %v583_v20 = vpop.permute.xlu0 %582 }
 0xebb   :  { %v585_v22 = vmul.f32 %v583_v20, %v574_v21 }
 0xebd   :  { %587 = vrot.lane.b32.xlu1 %v585_v22, %s961_s17  ;;  %v707_v22 = vld [vmem:[%s1178_s4] sm:$0xff] }
 0xf2f   :  { %v588_v25 = vpop.permute.xlu1 %587 }
 0xf30   :  { %v1124_v26 = vadd.f32 %v588_v25, %v580_v24 }
 0xf32   :  { %855 = vtanh.f32 %v1124_v26  ;;  %v648_v63 = vrot.slane %v1124_v26, 7 }
 0xf33   :  { %857 = vtanh.f32 %v111_v32 }
 0xf38   :  { %v856_v27 = vpop.eup %855 }
 0xf39   :  { %593 = vrot.lane.b32.xlu2 %v856_v27, %s960_s0  ;;  %v858_v33 = vpop.eup %857  ;;  %v715_v27 = vld [vmem:[%s1179_s5] sm:$0x1] }
 0xf93   :  { %v594_v29 = vpop.permute.xlu2 %593 }
 0xf94   :  { %v596_v30 = vmul.f32 %v594_v29, %v574_v21  ;;  %v708_v21 = vld [vmem:[%s1178_s4 + $0x8] sm:$0xff]  ;;  %s963_s4 = smov [#allocation7]  }
 0xf95   :  { %735 = vmatpush.msrb.mxu2 %v708_v21 }
 0xf96   :  { %v598_v31 = vrot.slane %v596_v30, 6 }
 0xf97   :  { %736 = vmatpush.msrb.mxu2 %v707_v22 }
 0xf98   :  { %599 = vrot.lane.b32.xlu0 %v598_v31, %s961_s17 }
 0xfa0   :  { %688 = vrot.lane.b32.xlu0 %v858_v33, %s960_s0 }
0x100a   :  { %v600_v34 = vpop.permute.xlu0 %599 }
0x100b   :  { %788 = vmatmul.msk.f32.vlgmr.msra.gmra.mxu1 %vm69_vm0, %v600_v34 }
0x1012   :  { %v689_v54 = vpop.permute.xlu0 %688 }
0x1088   :  { %v620_v35 = vpop.f32.mrf.mxu1 }
0x1089   :  { %v624_v36 = vrot.slane %v620_v35, 1 }
0x108b   :  { %v626_v37 = vadd.f32 %v624_v36, %v1059_v13 }
0x108d   :  { %859 = vtanh.f32 %v626_v37  ;;  %v789_v39 = vmul.f32 -1.442695, %v626_v37 }
0x108e   :  { %861 = vpow2.f32 %v790_v38 }
0x108f   :  { %863 = vpow2.f32 %v789_v39 }
0x1093   :  { %v860_v10 = vpop.eup %859 }
0x1094   :  { %652 = vrot.lane.b32.xlu1 %v860_v10, %s960_s0  ;;  %v862_v41 = vpop.eup %861 }
0x1095   :  { %v864_v40 = vpop.eup %863  ;;  %v670_v8 = vadd.f32 1.0, %v862_v41 }
0x1096   :  { %v630_v42 = vadd.f32 1.0, %v864_v40 }
0x1097   :  { %865 = vrcp.f32 %v670_v8  ;;  %vm676_vm14 = vweird.f32 %v670_v8  ;;  %v682_v46 = vand.u32 2147483648, %v670_v8  ;;  %v680_v48 = vand.u32 2147483647, %v670_v8 }
0x1098   :  { %867 = vrcp.f32 %v630_v42  ;;  %v642_v50 = vand.u32 2147483648, %v630_v42  ;;  %vm636_vm3 = vweird.f32 %v630_v42  ;;  %v640_v52 = vand.u32 2147483647, %v630_v42 }
0x1099   :  { %v683_v51 = vor.u32 1.1754944e-38, %v682_v46  ;;  %vm681_vm4 = vcmp.eq.f32.partialorder %v680_v48, 8.507059e+37 }
0x109a   :  { %v643_v56 = vor.u32 1.1754944e-38, %v642_v50  ;;  %vm641_vm6 = vcmp.eq.f32.partialorder %v640_v52, 8.507059e+37 }
0x109d   :  { %v866_v43 = vpop.eup %865 }
0x109e   :  { %v868_v0 = vpop.eup %867  ;;  %v672_v1 = vmul.f32 %v866_v43, %v670_v8  ;;  %vm677_vm15 = vweird.f32 %v866_v43 }
0x109f   :  { %v632_v4 = vmul.f32 %v868_v0, %v630_v42  ;;  %vm678_vm1 = vmor %vm676_vm14, %vm677_vm15  ;;  %vm637_vm2 = vweird.f32 %v868_v0 }
0x10a0   :  { %v673_v6 = vsub.f32 1.0, %v672_v1  ;;  %vm638_vm5 = vmor %vm636_vm3, %vm637_vm2 }
0x10a1   :  { %v633_v13 = vsub.f32 1.0, %v632_v4 }
0x10a2   :  { %v674_v44 = vmul.f32 %v866_v43, %v673_v6 }
0x10a3   :  { %v634_v45 = vmul.f32 %v868_v0, %v633_v13 }
0x10a4   :  { %v675_v47 = vadd.f32 %v866_v43, %v674_v44 }
0x10a5   :  { %v635_v49 = vadd.f32 %v868_v0, %v634_v45 }
0x10a6   :  { %v679_v53 = vsel %vm678_vm1, %v866_v43, %v675_v47 }
0x10a7   :  { %v639_v55 = vsel %vm638_vm5, %v868_v0, %v635_v49  ;;  %v684_v57 = vsel %vm681_vm4, %v683_v51, %v679_v53 }
0x10a8   :  { %v691_v58 = vmul.f32 %v689_v54, %v684_v57  ;;  %v644_v60 = vsel %vm641_vm6, %v643_v56, %v639_v55 }
0x10a9   :  { %v650_v2 = vmul.f32 %v648_v63, %v644_v60 }
0x10aa   :  { %869 = vtanh.f32 %v691_v58 }
0x10b0   :  { %v870_v62 = vpop.eup %869 }
0x1106   :  { %v653_v59 = vpop.permute.xlu1 %652 }
0x1107   :  { %v655_v61 = vmul.f32 %v653_v59, %v644_v60 }
0x1109   :  { %657 = vrot.lane.b32.xlu2 %v655_v61, %s961_s17 }
0x1111   :  { %694 = vrot.lane.b32.xlu2 %v870_v62, %s962_s1 }
0x1163   :  { %v658_v3 = vpop.permute.xlu2 %657 }
0x1164   :  { %v660_v5 = vadd.f32 %v658_v3, %v650_v2 }
0x1166   :  { %871 = vtanh.f32 %v660_v5 }
0x116b   :  { %v695_v9 = vpop.permute.xlu2 %694 }
0x116c   :  { %v872_v7 = vpop.eup %871  ;;  %v697_v11 = vmul.f32 %v695_v9, %v684_v57 }
0x116d   :  { %663 = vrot.lane.b32.xlu1 %v872_v7, %s960_s0 }
0x1175   :  { %703 = vrot.lane.b32.xlu1 %v697_v11, %s960_s0 }
0x11df   :  { %v664_v19 = vpop.permute.xlu1 %663 }
0x11e0   :  { %v666_v20 = vmul.f32 %v664_v19, %v644_v60 }
0x11e2   :  { %699 = vrot.lane.b32.xlu0 %v666_v20, %s961_s17  ;;  %s760_s17 = sshll.u32 %s963_s4, 4  ;;  %s761_s17 = int_to_ptr.vmem [resolvable:$true] %s760_s17 }
0x11e7   :  { %v704_v23 = vpop.permute.xlu1 %703 }
0x1254   :  { %v700_v24 = vpop.permute.xlu0 %699 }
0x1255   :  { %v706_v25 = vsel %vm69_vm0, %v700_v24, %v704_v23 }
0x1256   :  { %v717_v26 = vrot.slane %v706_v25, 7 }
0x1258   :  { %791 = vmatmul.msk.f32.vlgmr.msrb.gmra.mxu2 %vm718_vm7, %v717_v26 }
0x12db   :  { %v738_v28 = vpop.f32.mrf.mxu2 }
0x12dc   :  { %v739_v29 = vadd.f32 %v738_v28, %v715_v27 }
0x12de   :  { %v742_v30 = vsel %vm741_vm8, %v739_v29, -inf }
0x12df   :  { %743 = vmax.xlane.f32.xlu2 %v742_v30 }
0x1352   :  { %v744_v31 = vpop.xlane.xlu2 %743 }
0x1353   :  { %v745_v32 = vsub.f32 %v739_v29, %v744_v31 }
0x1355   :  { %v746_v33 = vmul.f32 1.442695, %v745_v32 }
0x1357   :  { %873 = vpow2.f32 %v746_v33 }
0x135d   :  { %v874_v34 = vpop.eup %873 }
0x135e   :  { %v748_v35 = vsel %vm741_vm8, %v874_v34, 0.0 }
0x135f   :  { %749 = vadd.xlane.f32.xlu0 %v748_v35 }
0x13d2   :  { %v750_v36 = vpop.xlane.xlu0 %749 }
0x13d3   :  { %875 = vlog2.f32 %v750_v36 }
0x13d9   :  { %v876_v37 = vpop.eup %875 }
0x13da   :  { %v752_v10 = vmul.f32 0.6931472, %v876_v37 }
0x13dc   :  { %v753_v38 = vsub.f32 %v745_v32, %v752_v10 }
0x13de   :  { %754 = vst.msk [vmem:[#allocation7] sm:$0x1] %vm741_vm8, %v753_v38 }
0x13df   :  { %765 = dma.vmem_to_hbm [thread:$0]  %s761_s17, 16, %s763_s19, [#allocation4]  }
0x13e0   :  { %953 = dma.done.wait [#allocation4], 16  }
0x13e1   :  { %954 = vsyncadd [#allocation4], 4294967280 }
0x13e2   :  { %770 = vsyncpa [#allocation3], 1 }
0x13e3   :  { %771 = vsyncpa [#allocation6], 1 }
0x13e4   :  { %772 = vsyncpa [#allocation4], 1 }

</bundles_post_ra>
